<compile_context>
chip_gen: v5e
topology: v5e:2x2
jax: 0.10.0
libtpu: 0.0.40
codegen_flags: <defaults>
</compile_context>

<pallas_src>
import jax
import jax.numpy as jnp
from jax.experimental import pallas as pl
from jax.experimental.pallas import tpu as pltpu


def _round_up(x, m):
    return ((x + m - 1) // m) * m


def _rowblock_matmul_kernel(a_ref, x_ref, o_ref):
    """o = A_rowtile @ X.  a_ref: (tm, Np) bf16, x_ref: (Np, Dp) bf16 resident,
    o_ref: (tm, Dp) f32 written directly (no accumulator scratch needed)."""
    o_ref[...] = jnp.dot(a_ref[...], x_ref[...],
                         preferred_element_type=jnp.float32)


def graph_propagate(adj_bf16, x_bf16, *, tm):
    """Pallas row-tiled matmul: (Np, Np) bf16 @ (Np, Dp) bf16 -> (Np, Dp) f32."""
    n_pad, _ = adj_bf16.shape
    d_pad = x_bf16.shape[1]
    assert n_pad % tm == 0 and d_pad % 128 == 0
    return pl.pallas_call(
        _rowblock_matmul_kernel,
        out_shape=jax.ShapeDtypeStruct((n_pad, d_pad), jnp.float32),
        grid_spec=pltpu.PrefetchScalarGridSpec(
            num_scalar_prefetch=0,
            grid=(n_pad // tm,),
            in_specs=[
                # adjacency row tile: streamed from HBM, double-buffered.
                pl.BlockSpec((tm, n_pad), lambda i: (i, 0)),
                # embeddings: constant block index -> fetched once, VMEM-resident.
                pl.BlockSpec((n_pad, d_pad), lambda i: (0, 0)),
            ],
            out_specs=pl.BlockSpec((tm, d_pad), lambda i: (i, 0)),
        ),
        compiler_params=pltpu.CompilerParams(
            dimension_semantics=("parallel",)),
    )(adj_bf16, x_bf16)


def graph_conv_forward(user_embed, item_embed, interact_mat, n_hops):
    """GraphConv.forward with mess_dropout=False, edge_dropout=False."""
    n_users = user_embed.shape[0]
    all_embed = jnp.concatenate([user_embed, item_embed], axis=0)  # (N, D) f32
    n, d = all_embed.shape

    # Row tile: 512 for large graphs (per-step overhead amortization, full MXU
    # occupancy); otherwise split N into >= 2 tiles for v7x's 2 TensorCores.
    if n >= 1024:
        tm = 512
    else:
        tm = _round_up(max(pl.cdiv(n, 2), 8), 8)
    n_pad = _round_up(n, tm)
    d_pad = _round_up(d, 128)   # lane-dense output stores

    # bf16 adjacency: halves the dominant HBM stream; f32 accumulation keeps
    # the error bounded (row-normalized values are well conditioned for bf16).
    adj_p = jnp.zeros((n_pad, n_pad), jnp.bfloat16)
    adj_p = adj_p.at[:n, :n].set(interact_mat.astype(jnp.bfloat16))

    agg = jnp.zeros((n_pad, d_pad), jnp.float32)
    agg = agg.at[:n, :d].set(all_embed.astype(jnp.float32))

    embs = [agg]
    for _ in range(n_hops):
        # cast the running embeddings to bf16 only as the matmul operand;
        # stored per-hop embeddings stay f32 (matches module semantics).
        agg = graph_propagate(adj_p, agg.astype(jnp.bfloat16), tm=tm)
        embs.append(agg)

    # NOTE: stack + slice is a small XLA epilogue copy; at real scale each hop
    # could write its slice of a preallocated (H+1, N, D) buffer in place.
    embs = jnp.stack(embs, axis=1)[:n, :, :d]        # (N, H+1, D) f32
    return embs[:n_users], embs[n_users:]


if __name__ == "__main__":
    # Small deterministic problem: 128 users + 128 items, hidden = 64, 3 hops.
    n_users, n_items, hidden, n_hops = 128, 128, 64, 3
    n_nodes = n_users + n_items

    key = jax.random.PRNGKey(0)
    k_u, k_i, k_a = jax.random.split(key, 3)
    user_embed = jax.random.normal(k_u, (n_users, hidden), dtype=jnp.float32) * 0.1
    item_embed = jax.random.normal(k_i, (n_items, hidden), dtype=jnp.float32) * 0.1

    # Deterministic synthetic normalized bipartite adjacency (dense stand-in
    # for the sparse interact_mat): user-item block + its transpose, scaled.
    ui = (jax.random.uniform(k_a, (n_users, n_items)) > 0.9).astype(jnp.float32)
    adj = jnp.zeros((n_nodes, n_nodes), dtype=jnp.float32)
    adj = adj.at[:n_users, n_users:].set(ui)
    adj = adj.at[n_users:, :n_users].set(ui.T)
    deg = jnp.clip(adj.sum(axis=1, keepdims=True), 1.0, None)
    adj = adj / deg  # row-normalized

    u_out, i_out = graph_conv_forward(user_embed, item_embed, adj, n_hops)
    u_out = jax.block_until_ready(u_out)
    i_out = jax.block_until_ready(i_out)

    # Pure-JAX f32 reference; kernel uses bf16 operands with f32 accumulation,
    # so allow a small tolerance on the propagated hops (hop 0 is exact).
    all_e = jnp.concatenate([user_embed, item_embed], axis=0)
    agg, ref_embs = all_e, [all_e]
    for _ in range(n_hops):
        agg = adj @ agg
        ref_embs.append(agg)
    ref = jnp.stack(ref_embs, axis=1)

    assert u_out.shape == (n_users, n_hops + 1, hidden)
    assert i_out.shape == (n_items, n_hops + 1, hidden)
    assert jnp.allclose(u_out[:, 0], user_embed, atol=1e-6)
    assert jnp.allclose(i_out[:, 0], item_embed, atol=1e-6)
    assert jnp.allclose(u_out, ref[:n_users], atol=1e-2, rtol=1e-2)
    assert jnp.allclose(i_out, ref[n_users:], atol=1e-2, rtol=1e-2)

    print("KERNEL_OK")
</pallas_src>

<mosaic_0001>
module attributes {stable_mosaic.version = 11 : i64} {
  func.func @_rowblock_matmul_kernel(%arg0: i32, %arg1: memref<128x256xbf16, #tpu.memory_space<vmem>>, %arg2: memref<256x128xbf16, #tpu.memory_space<vmem>>, %arg3: memref<128x128xf32, #tpu.memory_space<vmem>>) attributes {dimension_semantics = [#tpu.dimension_semantics<parallel>], iteration_bounds = array<i64: 2>, scalar_prefetch = 0 : i64, scratch_operands = 0 : i64, tpu.core_type = #tpu.core_type<tc>, window_params = [{transform_indices = @transform_0, window_bounds = array<i64: 128, 256>}, {pipeline_mode = #tpu.pipeline_mode<synchronous>, transform_indices = @transform_1, window_bounds = array<i64: 256, 128>}, {transform_indices = @transform_2, window_bounds = array<i64: 128, 128>}]} {
    %c0 = arith.constant 0 : index
    %c0_0 = arith.constant 0 : index
    %0 = vector.load %arg1[%c0, %c0_0] : memref<128x256xbf16, #tpu.memory_space<vmem>>, vector<128x256xbf16>
    %c0_1 = arith.constant 0 : index
    %c0_2 = arith.constant 0 : index
    %1 = vector.load %arg2[%c0_1, %c0_2] : memref<256x128xbf16, #tpu.memory_space<vmem>>, vector<256x128xbf16>
    %cst = arith.constant dense<0.000000e+00> : vector<128x128xf32>
    %2 = tpu.matmul %0, %1, %cst {dimension_numbers = #tpu.dot_dimension_numbers<[1], [0], [0], [1], [0, 0, 1, 1], [], []>} : vector<128x256xbf16>, vector<256x128xbf16>, vector<128x128xf32> -> vector<128x128xf32>
    %c0_3 = arith.constant 0 : index
    %c0_4 = arith.constant 0 : index
    %3 = vector.load %arg3[%c0_3, %c0_4] : memref<128x128xf32, #tpu.memory_space<vmem>>, vector<128x128xf32>
    tpu.vector_store %arg3[%c0_3, %c0_4], %2 {strides = array<i32>} : memref<128x128xf32, #tpu.memory_space<vmem>>, vector<128x128xf32>,
    return
  }
  func.func @transform_0(%arg0: i32) -> (i32, i32) {
    %c0_i32 = arith.constant 0 : i32
    %c0_i32_0 = arith.constant 0 : i32
    return %arg0, %c0_i32 : i32, i32
  }
  func.func @transform_1(%arg0: i32) -> (i32, i32) {
    %c0_i32 = arith.constant 0 : i32
    %c0_i32_0 = arith.constant 0 : i32
    %c0_i32_1 = arith.constant 0 : i32
    return %c0_i32, %c0_i32_0 : i32, i32
  }
  func.func @transform_2(%arg0: i32) -> (i32, i32) {
    %c0_i32 = arith.constant 0 : i32
    %c0_i32_0 = arith.constant 0 : i32
    return %arg0, %c0_i32 : i32, i32
  }
}

</mosaic_0001>

<bundles_post_ra>
// kernel: tpu_custom_call.1
= control target key start
LH: loop header
LB: loop body
LE: loop exit
PB: predicated region body
PF: predicated region fallthrough
CT: control target
= control target key end

     0   :  { %7 = vsyncpa [#allocation3], 0  ;;  %s1231_s0 = inlined_call_operand.hbm [shape: bf16[256,256], index: 0, kind: input, shape index: {}]   ;;  %s1232_s1 = inlined_call_operand.hbm [shape: bf16[256,128], index: 1, kind: input, shape index: {}]   ;;  %s1233_s2 = inlined_call_operand.hbm [shape: f32[256,128], index: 2, kind: output, shape index: {}]  }
   0x1   :  { %9 = vsyncpa [#allocation3 + $0x1], 0 }
   0x2   :  { %10 = vsyncpa [#allocation6], 0 }
   0x3   :  { %11 = vsyncpa [#allocation4], 0 }
   0x4   :  { %13 = vsyncpa [#allocation4 + $0x1], 0  ;;  %s1034_s9 = smov 0   ;;  %s1036_s10 = smov 0  }
   0x5   :  { %s1038_s11 = smov 0   ;;  %s1040_s12 = smov 0  }
   0x6 LB: > { %s1055_s13 = sadd.s32 4294967295, %s1010_s12   ;;  %s621_s14 = sadd.s32 4294967294, %s1010_s12   ;;  %s1010_s12 = sphi %s1040_s12, %s1243_s12   ;;  %s1006_s11 = sphi %s1038_s11, %s1242_s11   ;;  %s1002_s10 = sphi %s1036_s10, %s1241_s10   ;;  %s998_s9 = sphi %s1034_s9, %s1240_s9  }
   0x7   : > { %p39_p0 = scmp.ne.s32.totalorder %s1002_s10, %s998_s9  ;;  %p40_p1 = scmp.eq.s32.totalorder %s1055_s13, 0 }
   0x8   : > { %p84_p2 = scmp.eq.s32.totalorder %s1055_s13, 1  ;;  %p90_p3 = scmp.eq.s32.totalorder %s621_s14, 1 }
   0x9   : > { %p1064_p4 = por %p40_p1, %p39_p0  ;;  %p622_p5 = scmp.ge.s32.totalorder %s1010_s12, 1 }
   0xa   : > { %p1069_p6 = por %p90_p3, %p39_p0  ;;  %p97_p7 = scmp.lt.s32.totalorder %s1010_s12, 3 }
   0xb   : > { %s108_s19 = sshll.u32 %s1232_s1, 4  ;;  %s1012_s21 = smov [#allocation5]   ;;  %s109_s19 = int_to_ptr.hbm [resolvable:$true] %s108_s19 }
   0xc   : > { %p1077_p8 = pnand %p622_p5, %p97_p7  ;;  %s110_s22 = sshll.u32 %s1012_s21, 4  ;;  %s111_s22 = int_to_ptr.vmem [resolvable:$true] %s110_s22 }
   0xd   : > { %s1087_s23 = sadd.s32 1, %s1010_s12   ;;  %s1013_s24 = smov 64  }
   0xe   : > { %p825_p9 = pneg %p1077_p8  ;;  %s1014_s25 = smov 4  }
   0xf   : > { %s23_s26 = ssub.s32 %s1010_s12, %s1087_s23  ;;  %s26_s27 = sadd.s32 1, %s1006_s11 }
  0x10   : > { %p826_p10 = pnand %p825_p9, %p40_p1  ;;  %p24_p12 = scmp.eq.s32.totalorder %s23_s26, 0 }
  0x11   : > { %p33_p13 = scmp.ne.s32.totalorder %s1006_s11, %s1002_s10  ;;  %p34_p0 = scmp.eq.s32.totalorder %s1010_s12, 0 }
  0x12   : > { %828 = dma.hbm_to_vmem [thread:$0]  (!%p826_p10), %s109_s19, 2048, %s111_s22, [#allocation6], %s1013_s24, %s1013_s24, %s1014_s25  }
  0x13   : > { %p838_p3 = scmp.lt.s32.totalorder %s1010_s12, 2  ;;  %p35_p5 = por %p34_p0, %p33_p13 }
  0x14   : > { %s1097_s28 = scalar_select %p24_p12, %s1006_s11, %s26_s27  }
  0x15   : > { %p1101_p7 = por %p84_p2, %p33_p13  ;;  %s124_s30 = sand.u32 1, %s1006_s11  }
  0x16   : > { %s767_s3 = sshll.u32 %s1010_s12, 7  ;;  %s625_s4 = sshll.u32 %s124_s30, 7 }
  0x17   : > { %s134_s7 = scalar_lea.hbm %s1231_s0, %s767_s3  ;;  %s128_s14 = scalar_lea.vmem [#allocation2], %s625_s4 }
  0x18   : > { %s135_s8 = sshll.u32 %s134_s7, 4  ;;  %s137_s17 = sshll.u32 %s128_s14, 4  ;;  %s136_s8 = int_to_ptr.hbm [resolvable:$true] %s135_s8  ;;  %s138_s17 = int_to_ptr.vmem [resolvable:$true] %s137_s17 }
  0x19   : > { %p1112_p9 = pnand %p838_p3, %p35_p5  ;;  %s125_s19 = scalar_lea.sflag [#allocation3], %s124_s30 }
  0x1a   : > { %s910_s21 = sshra.s32 %s136_s8, 4  ;;  %s917_s26 = scalar_lea.hbm %s1231_s0, 256  ;;  %s911_s21 = int_to_ptr.hbm [resolvable:$true] %s910_s21 }
  0x1b   : > { %s912_s22 = scalar_lea.hbm %s911_s21, 128  ;;  %p914_p10 = pneg %p1112_p9 }
  0x1c   : > { %p913_p2 = scmp.ne.s32.totalorder %s911_s21, %s912_s22  ;;  %p918_p0 = scmp.lt.s32.totalorder %s911_s21, %s1231_s0 }
  0x1d   : > { %p919_p3 = scmp.lt.s32.totalorder %s917_s26, %s912_s22 }
  0x1e   : > { %p915_p12 = pnand %p914_p10, %p913_p2 }
  0x1f   : > { %p920_p5 = por %p919_p3, %p918_p0 }
  0x20   : > { %p916_p13 = pneg %p915_p12 }
  0x22   : > { %p921_p11 = pnand %p920_p5, %p916_p13 }
  0x24   : > { %924 = shalt.err (!%p921_p11)
}
  0x25   : > { %s1015_s30 = smov 128   ;;  %s1016_s4 = smov 8  }
  0x26   : > { %832 = dma.hbm_to_vmem [thread:$0]  (!%p1112_p9), %s136_s8, 2048, %s138_s17, %s125_s19, %s1015_s30, %s1015_s30, %s1016_s4  }
  0x27   : > { %149 = sbr.rel (%p1077_p8) target bundleno = 274 (0x112), region = 28  ;;  %s1129_s5 = sand.u32 (!%p1077_p8), 1, %s1002_s10  }
  0x28   : > { %s630_s6 = sshll.u32 (!%p1077_p8), %s1129_s5, 7  ;;  %s152_s7 = scalar_lea.sflag (!%p1077_p8), [#allocation3], %s1129_s5 }
  0x29   : > { %s1135_s14 = scalar_lea.vmem (!%p1077_p8), [#allocation2], %s630_s6 }
  0x2c   : > { %985 = dma.done.wait (%p1064_p4), %s152_s7, 2048  }
  0x2d   : > { %987 = vsyncadd (%p1064_p4), %s152_s7, 4294965248 }
  0x2e   : > { %989 = dma.done.wait (%p40_p1), [#allocation6], 2048  }
  0x2f   : > { %991 = vsyncadd (%p40_p1), [#allocation6], 4294965248  ;;  %v791_v0 = vld [vmem:[#allocation5 + $0x38] sm:$0xff]  ;;  %v790_v2 = vld [vmem:[#allocation5 + $0x30] sm:$0xff]  ;;  %s1179_s15 = scalar_lea.vmem [#allocation7], %s630_s6  ;;  %s800_s20 = sshll.u32 %s1055_s13, 7 }
  0x30   : > { %v799_v1 = vld [vmem:[#allocation5 + $0x78] sm:$0xff]  ;;  %408 = vmatpush.bf16.msra.mxu0 %v791_v0  ;;  %801 = vmatpush.bf16.msra.mxu2 %v791_v0  ;;  %v798_v3 = vld [vmem:[#allocation5 + $0x70] sm:$0xff]  ;;  %v789_v4 = vld [vmem:[#allocation5 + $0x28] sm:$0xff]  ;;  %s534_s18 = scalar_lea.hbm %s1233_s2, %s800_s20  ;;  %s535_s19 = sshll.u32 %s1179_s15, 4  ;;  %s536_s19 = int_to_ptr.vmem [resolvable:$true] %s535_s19 }
  0x31   : > { %457 = vmatpush.bf16.msra.mxu1 %v799_v1  ;;  %809 = vmatpush.bf16.msra.mxu3 %v799_v1  ;;  %v797_v5 = vld [vmem:[#allocation5 + $0x68] sm:$0xff]  ;;  %v788_v6 = vld [vmem:[#allocation5 + $0x20] sm:$0xff]  ;;  %v787_v8 = vld [vmem:[#allocation5 + $0x18] sm:$0xff]  ;;  %s537_s21 = sshll.u32 %s534_s18, 4  ;;  %s523_s13 = scalar_lea.sflag [#allocation4], %s1129_s5  ;;  %s538_s21 = int_to_ptr.hbm [resolvable:$true] %s537_s21 }
  0x32   : > { %v796_v7 = vld [vmem:[#allocation5 + $0x60] sm:$0xff]  ;;  %v795_v9 = vld [vmem:[#allocation5 + $0x58] sm:$0xff]  ;;  %v786_v10 = vld [vmem:[#allocation5 + $0x10] sm:$0xff]  ;;  %s954_s22 = sshra.s32 %s538_s21, 4  ;;  %s960_s27 = scalar_lea.hbm %s1233_s2, 256  ;;  %s955_s22 = int_to_ptr.hbm [resolvable:$true] %s954_s22 }
  0x33   : > { %v794_v11 = vld [vmem:[#allocation5 + $0x50] sm:$0xff]  ;;  %v785_v12 = vld [vmem:[#allocation5 + $0x8] sm:$0xff]  ;;  %v784_v14 = vld [vmem:[#allocation5] sm:$0xff]  ;;  %s956_s24 = scalar_lea.hbm %s955_s22, 128  ;;  %p961_p11 = scmp.lt.s32.totalorder %s955_s22, %s1233_s2 }
  0x34   : > { %409 = vmatpush.bf16.msra.mxu0 %v790_v2  ;;  %802 = vmatpush.bf16.msra.mxu2 %v790_v2  ;;  %v793_v13 = vld [vmem:[#allocation5 + $0x48] sm:$0xff]  ;;  %v792_v15 = vld [vmem:[#allocation5 + $0x40] sm:$0xff]  ;;  %v643_v28 = vld [vmem:[%s1135_s14 + $0x10] sm:$0xf]  ;;  %p957_p1 = scmp.ne.s32.totalorder %s955_s22, %s956_s24  ;;  %p962_p9 = scmp.lt.s32.totalorder %s960_s27, %s956_s24 }
  0x35   : > { %458 = vmatpush.bf16.msra.mxu1 %v798_v3  ;;  %810 = vmatpush.bf16.msra.mxu3 %v798_v3  ;;  %v635_v16 = vld [vmem:[%s1135_s14] sm:$0xf]  ;;  %v769_v17 = vld [vmem:[%s1135_s14 + $0x4] sm:$0xf0]  ;;  %v768_v20 = vld [vmem:[%s1135_s14 + $0x4] sm:$0xf] }
  0x36   : > { %v667_v18 = vld [vmem:[%s1135_s14 + $0x40] sm:$0xf]  ;;  %v777_v19 = vld [vmem:[%s1135_s14 + $0x44] sm:$0xf0]  ;;  %v637_v21 = vld [vmem:[%s1135_s14 + $0x8] sm:$0xf0]  ;;  %v636_v24 = vor.u32 %v769_v17, %v635_v16  ;;  %p958_p4 = pnand %p957_p1, %p1101_p7  ;;  %p963_p2 = por %p962_p9, %p961_p11 }
  0x37   : > { %v776_v22 = vld [vmem:[%s1135_s14 + $0x44] sm:$0xf]  ;;  %v669_v23 = vld [vmem:[%s1135_s14 + $0x48] sm:$0xf0]  ;;  %v668_v25 = vor.u32 %v777_v19, %v667_v18  ;;  %v640_v26 = vor.u32 %v768_v20, %v637_v21  ;;  %v771_v29 = vld [vmem:[%s1135_s14 + $0x14] sm:$0xf0] }
  0x38   : > { %410 = vmatpush.bf16.msra.mxu0 %v789_v4  ;;  %803 = vmatpush.bf16.msra.mxu2 %v789_v4  ;;  %v672_v27 = vor.u32 %v776_v22, %v669_v23  ;;  %v675_v30 = vld [vmem:[%s1135_s14 + $0x50] sm:$0xf]  ;;  %v779_v31 = vld [vmem:[%s1135_s14 + $0x54] sm:$0xf0]  ;;  %v770_v32 = vld [vmem:[%s1135_s14 + $0x14] sm:$0xf]  ;;  %v644_v36 = vor.u32 %v771_v29, %v643_v28  ;;  %p959_p8 = pneg %p958_p4 }
  0x39   : > { %459 = vmatpush.bf16.msra.mxu1 %v797_v5  ;;  %811 = vmatpush.bf16.msra.mxu3 %v797_v5  ;;  %v645_v33 = vld [vmem:[%s1135_s14 + $0x18] sm:$0xf0]  ;;  %v778_v34 = vld [vmem:[%s1135_s14 + $0x54] sm:$0xf]  ;;  %v676_v37 = vor.u32 %v779_v31, %v675_v30  ;;  %v651_v40 = vld [vmem:[%s1135_s14 + $0x20] sm:$0xf] }
  0x3a   : > { %v677_v35 = vld [vmem:[%s1135_s14 + $0x58] sm:$0xf0]  ;;  %v648_v38 = vor.u32 %v770_v32, %v645_v33  ;;  %v773_v41 = vld [vmem:[%s1135_s14 + $0x24] sm:$0xf0]  ;;  %v683_v42 = vld [vmem:[%s1135_s14 + $0x60] sm:$0xf]  ;;  %p964_p10 = pnand %p963_p2, %p959_p8 }
  0x3b   : > { %v680_v39 = vor.u32 %v778_v34, %v677_v35  ;;  %v781_v43 = vld [vmem:[%s1135_s14 + $0x64] sm:$0xf0]  ;;  %v772_v44 = vld [vmem:[%s1135_s14 + $0x24] sm:$0xf]  ;;  %v653_v45 = vld [vmem:[%s1135_s14 + $0x28] sm:$0xf0]  ;;  %v652_v48 = vor.u32 %v773_v41, %v651_v40 }
  0x3c   : > { %411 = vmatpush.bf16.msra.mxu0 %v788_v6  ;;  %804 = vmatpush.bf16.msra.mxu2 %v788_v6  ;;  %v780_v46 = vld [vmem:[%s1135_s14 + $0x64] sm:$0xf]  ;;  %v685_v47 = vld [vmem:[%s1135_s14 + $0x68] sm:$0xf0]  ;;  %v684_v49 = vor.u32 %v781_v43, %v683_v42  ;;  %v656_v50 = vor.u32 %v772_v44, %v653_v45  ;;  %v659_v52 = vld [vmem:[%s1135_s14 + $0x30] sm:$0xf] }
  0x3d   : > { %460 = vmatpush.bf16.msra.mxu1 %v796_v7  ;;  %812 = vmatpush.bf16.msra.mxu3 %v796_v7  ;;  %v688_v51 = vor.u32 %v780_v46, %v685_v47  ;;  %v775_v53 = vld [vmem:[%s1135_s14 + $0x34] sm:$0xf0]  ;;  %v691_v54 = vld [vmem:[%s1135_s14 + $0x70] sm:$0xf]  ;;  %v774_v56 = vld [vmem:[%s1135_s14 + $0x34] sm:$0xf] }
  0x3e   : > { %v783_v55 = vld [vmem:[%s1135_s14 + $0x74] sm:$0xf0]  ;;  %v661_v57 = vld [vmem:[%s1135_s14 + $0x38] sm:$0xf0]  ;;  %v782_v58 = vld [vmem:[%s1135_s14 + $0x74] sm:$0xf]  ;;  %v660_v60 = vor.u32 %v775_v53, %v659_v52 }
  0x3f   : > { %v693_v59 = vld [vmem:[%s1135_s14 + $0x78] sm:$0xf0]  ;;  %v692_v61 = vor.u32 %v783_v55, %v691_v54  ;;  %v664_v62 = vor.u32 %v774_v56, %v661_v57 }
  0x40   : > { %412 = vmatpush.bf16.msra.mxu0 %v787_v8  ;;  %805 = vmatpush.bf16.msra.mxu2 %v787_v8  ;;  %v696_v63 = vor.u32 %v782_v58, %v693_v59 }
  0x41   : > { %461 = vmatpush.bf16.msra.mxu1 %v795_v9  ;;  %813 = vmatpush.bf16.msra.mxu3 %v795_v9 }
  0x44   : > { %413 = vmatpush.bf16.msra.mxu0 %v786_v10  ;;  %806 = vmatpush.bf16.msra.mxu2 %v786_v10 }
  0x45   : > { %462 = vmatpush.bf16.msra.mxu1 %v794_v11  ;;  %814 = vmatpush.bf16.msra.mxu3 %v794_v11 }
  0x48   : > { %414 = vmatpush.bf16.msra.mxu0 %v785_v12  ;;  %807 = vmatpush.bf16.msra.mxu2 %v785_v12 }
  0x49   : > { %463 = vmatpush.bf16.msra.mxu1 %v793_v13  ;;  %815 = vmatpush.bf16.msra.mxu3 %v793_v13 }
  0x4c   : > { %415 = vmatpush.bf16.msra.mxu0 %v784_v14  ;;  %808 = vmatpush.bf16.msra.mxu2 %v784_v14 }
  0x4d   : > { %464 = vmatpush.bf16.msra.mxu1 %v792_v15  ;;  %816 = vmatpush.bf16.msra.mxu3 %v792_v15 }
  0x4f   : > { %416 = vmatmul.bf16.vlgmr.msra.gmra.mxu0 %v636_v24  ;;  %436 = vmatmul.bf16.vlgmr.msra.gmra.mxu2 %v668_v25 }
  0x50   : > { %465 = vmatmul.bf16.vlgmr.msra.gmra.mxu1 %v640_v26  ;;  %485 = vmatmul.bf16.vlgmr.msra.gmra.mxu3 %v672_v27 }
  0x5f   : > { %421 = vmatmul.bf16.gmra.mxu0 %v644_v36  ;;  %441 = vmatmul.bf16.gmra.mxu2 %v676_v37 }
  0x60   : > { %470 = vmatmul.bf16.gmra.mxu1 %v648_v38  ;;  %490 = vmatmul.bf16.gmra.mxu3 %v680_v39 }
  0x6f   : > { %426 = vmatmul.bf16.gmra.mxu0 %v652_v48  ;;  %446 = vmatmul.bf16.gmra.mxu2 %v684_v49 }
  0x70   : > { %475 = vmatmul.bf16.gmra.mxu1 %v656_v50  ;;  %495 = vmatmul.bf16.gmra.mxu3 %v688_v51 }
  0x7f   : > { %431 = vmatmul.bf16.gmra.mxu0 %v660_v60  ;;  %451 = vmatmul.bf16.gmra.mxu2 %v692_v61 }
  0x80   : > { %480 = vmatmul.bf16.gmra.mxu1 %v664_v62  ;;  %500 = vmatmul.bf16.gmra.mxu3 %v696_v63 }
  0xcc   : > { %v417_v0 = vpop.f32.mrf.mxu0 }
  0xcd   : > { %v466_v1 = vpop.f32.mrf.mxu1 }
  0xce   : > { %v467_v2 = vadd.f32 %v466_v1, %v417_v0 }
  0xd0   : > { %506 = vst [vmem:[%s1179_s15] sm:$0xff] %v467_v2 }
  0xd2   : > { %v437_v3 = vpop.f32.mrf.mxu2 }
  0xd3   : > { %v486_v4 = vpop.f32.mrf.mxu3 }
  0xd4   : > { %v487_v5 = vadd.f32 %v486_v4, %v437_v3  ;;  %v419_v6 = vpop.f32.mrf.mxu0 }
  0xd5   : > { %v468_v7 = vpop.f32.mrf.mxu1 }
  0xd6   : > { %514 = vst [vmem:[%s1179_s15 + $0x40] sm:$0xff] %v487_v5  ;;  %v469_v8 = vadd.f32 %v468_v7, %v419_v6 }
  0xd8   : > { %507 = vst [vmem:[%s1179_s15 + $0x8] sm:$0xff] %v469_v8 }
  0xda   : > { %v439_v9 = vpop.f32.mrf.mxu2 }
  0xdb   : > { %v488_v10 = vpop.f32.mrf.mxu3 }
  0xdc   : > { %v489_v11 = vadd.f32 %v488_v10, %v439_v9  ;;  %v422_v12 = vpop.f32.mrf.mxu0 }
  0xdd   : > { %v471_v13 = vpop.f32.mrf.mxu1 }
  0xde   : > { %515 = vst [vmem:[%s1179_s15 + $0x48] sm:$0xff] %v489_v11  ;;  %v472_v14 = vadd.f32 %v471_v13, %v422_v12 }
  0xe0   : > { %508 = vst [vmem:[%s1179_s15 + $0x10] sm:$0xff] %v472_v14 }
  0xe2   : > { %v442_v15 = vpop.f32.mrf.mxu2 }
  0xe3   : > { %v491_v16 = vpop.f32.mrf.mxu3 }
  0xe4   : > { %v492_v17 = vadd.f32 %v491_v16, %v442_v15  ;;  %v424_v18 = vpop.f32.mrf.mxu0 }
  0xe5   : > { %v473_v19 = vpop.f32.mrf.mxu1 }
  0xe6   : > { %516 = vst [vmem:[%s1179_s15 + $0x50] sm:$0xff] %v492_v17  ;;  %v474_v20 = vadd.f32 %v473_v19, %v424_v18 }
  0xe8   : > { %509 = vst [vmem:[%s1179_s15 + $0x18] sm:$0xff] %v474_v20 }
  0xea   : > { %v444_v21 = vpop.f32.mrf.mxu2 }
  0xeb   : > { %v493_v22 = vpop.f32.mrf.mxu3 }
  0xec   : > { %v494_v23 = vadd.f32 %v493_v22, %v444_v21  ;;  %v427_v24 = vpop.f32.mrf.mxu0 }
  0xed   : > { %v476_v25 = vpop.f32.mrf.mxu1 }
  0xee   : > { %517 = vst [vmem:[%s1179_s15 + $0x58] sm:$0xff] %v494_v23  ;;  %v477_v26 = vadd.f32 %v476_v25, %v427_v24 }
  0xf0   : > { %510 = vst [vmem:[%s1179_s15 + $0x20] sm:$0xff] %v477_v26 }
  0xf2   : > { %v447_v27 = vpop.f32.mrf.mxu2 }
  0xf3   : > { %v496_v28 = vpop.f32.mrf.mxu3 }
  0xf4   : > { %v497_v29 = vadd.f32 %v496_v28, %v447_v27  ;;  %v429_v30 = vpop.f32.mrf.mxu0 }
  0xf5   : > { %v478_v31 = vpop.f32.mrf.mxu1 }
  0xf6   : > { %518 = vst [vmem:[%s1179_s15 + $0x60] sm:$0xff] %v497_v29  ;;  %v479_v32 = vadd.f32 %v478_v31, %v429_v30 }
  0xf8   : > { %511 = vst [vmem:[%s1179_s15 + $0x28] sm:$0xff] %v479_v32 }
  0xfa   : > { %v449_v33 = vpop.f32.mrf.mxu2 }
  0xfb   : > { %v498_v34 = vpop.f32.mrf.mxu3 }
  0xfc   : > { %v499_v35 = vadd.f32 %v498_v34, %v449_v33  ;;  %v432_v36 = vpop.f32.mrf.mxu0 }
  0xfd   : > { %v481_v37 = vpop.f32.mrf.mxu1 }
  0xfe   : > { %519 = vst [vmem:[%s1179_s15 + $0x68] sm:$0xff] %v499_v35  ;;  %v482_v38 = vadd.f32 %v481_v37, %v432_v36 }
 0x100   : > { %512 = vst [vmem:[%s1179_s15 + $0x30] sm:$0xff] %v482_v38 }
 0x102   : > { %v452_v39 = vpop.f32.mrf.mxu2 }
 0x103   : > { %v501_v40 = vpop.f32.mrf.mxu3 }
 0x104   : > { %v502_v41 = vadd.f32 %v501_v40, %v452_v39  ;;  %v434_v42 = vpop.f32.mrf.mxu0 }
 0x105   : > { %v483_v43 = vpop.f32.mrf.mxu1 }
 0x106   : > { %520 = vst [vmem:[%s1179_s15 + $0x70] sm:$0xff] %v502_v41  ;;  %v484_v44 = vadd.f32 %v483_v43, %v434_v42 }
 0x108   : > { %513 = vst [vmem:[%s1179_s15 + $0x38] sm:$0xff] %v484_v44 }
 0x10a   : > { %v454_v45 = vpop.f32.mrf.mxu2 }
 0x10b   : > { %v503_v46 = vpop.f32.mrf.mxu3 }
 0x10c   : > { %v504_v47 = vadd.f32 %v503_v46, %v454_v45 }
 0x10e   : > { %521 = vst [vmem:[%s1179_s15 + $0x78] sm:$0xff] %v504_v47 }
 0x10f   : > { %967 = shalt.err (!%p964_p10)
}
 0x110   : > { %s1017_s4 = smov 128   ;;  %s1018_s5 = smov 8  }
 0x111   : > { %823 = dma.vmem_to_hbm [thread:$0]  (%p1101_p7), %s536_s19, 2048, %s538_s21, %s523_s13, %s1017_s4, %s1017_s4, %s1018_s5  }
 0x112 PF: > { %s552_s6 = sand.u32 1, %s998_s9   ;;  %p1239_p12 = scmp.ge.s32.totalorder %s1010_s12, 2 }
 0x113   : > { %s553_s7 = scalar_lea.sflag [#allocation4], %s552_s6 }
 0x114   : > { %p834_p13 = pnand %p1239_p12, %p1069_p6 }
 0x116   : > { %p835_p0 = pneg %p834_p13 }
 0x118   : > { %993 = dma.done.wait (%p835_p0), %s553_s7, 2048  }
 0x119   : > { %995 = vsyncadd (%p835_p0), %s553_s7, 4294965248  ;;  %p16_p3 = scmp.ge.s32.totalorder %s1087_s23, 4   ;;  %s1240_s9 = smov %s1002_s10 }
 0x11a   : > { %s1241_s10 = smov %s1006_s11  ;;  %s1242_s11 = smov %s1097_s28 }
 0x11b   : > { %s1243_s12 = smov %s1087_s23  ;;  %18 = sbr.rel (!%p16_p3) target bundleno = 6 (0x6), region = 77 }
 0x120   :  { %559 = vsyncpa [#allocation3], 1 }
 0x121   :  { %561 = vsyncpa [#allocation3 + $0x1], 1 }
 0x122   :  { %562 = vsyncpa [#allocation6], 1 }
 0x123   :  { %563 = vsyncpa [#allocation4], 1 }
 0x124   :  { %565 = vsyncpa [#allocation4 + $0x1], 1 }

</bundles_post_ra>
